<compile_context>
chip_gen: v5e
topology: v5e:2x2
jax: 0.10.0
libtpu: 0.0.40
codegen_flags: <defaults>
</compile_context>

<pallas_src>
import functools

import jax
import jax.numpy as jnp
from jax.experimental import pallas as pl
from jax.experimental.pallas import tpu as pltpu


# ----------------------------------------------------------------------------- kernel


def _attention_kernel(x_ref, wqkv_ref, bqkv_ref, wproj_ref, bproj_ref,
                      o_ref, acc_ref, *, heads_per_group, head_dim):
    """One grid step = (one batch tile, one group of G attention heads)."""
    g = pl.program_id(1)
    Bt, T, D = x_ref.shape
    G, hd = heads_per_group, head_dim
    gh = G * hd
    M = Bt * T

    @pl.when(g == 0)
    def _init():
        acc_ref[...] = jnp.zeros_like(acc_ref)

    # ---- grouped QKV projection: (M, D) @ (D, 3*G*hd), f32 accumulation ----
    x = x_ref[...].reshape(M, D)                 # layout no-op when T % 8 == 0
    w_qkv = wqkv_ref[0].astype(x.dtype)          # keep MXU operands in input dtype
    qkv = jnp.dot(x, w_qkv, preferred_element_type=jnp.float32)
    qkv = qkv + bqkv_ref[0].astype(jnp.float32)  # (M, 3*gh) f32

    # group-level q/k/v slices; lane-aligned when gh % 128 == 0.
    # (softmax scale already folded into the q weights/bias on the host)
    q = qkv[:, 0 * gh:1 * gh].astype(x.dtype)
    k = qkv[:, 1 * gh:2 * gh].astype(x.dtype)
    v = qkv[:, 2 * gh:3 * gh].astype(x.dtype)

    # ---- per-head (within the group), sample-batched attention --------------
    head_outs = []
    for h in range(G):                            # G is small (typically 2..4)
        qh = q[:, h * hd:(h + 1) * hd].reshape(Bt, T, hd)
        kh = k[:, h * hd:(h + 1) * hd].reshape(Bt, T, hd)
        vh = v[:, h * hd:(h + 1) * hd].reshape(Bt, T, hd)

        s = jnp.einsum("bqd,bkd->bqk", qh, kh,
                       preferred_element_type=jnp.float32)       # (Bt, T, T) f32
        s = s - jnp.max(s, axis=-1, keepdims=True)
        p = jnp.exp(s)
        attn = p * pl.reciprocal(jnp.sum(p, axis=-1, keepdims=True), approx=True)
        # TODO(synk): attn_drop / proj_drop are nn.Dropout(0.0) -> identity; no RNG.

        ho = jnp.einsum("bqk,bkd->bqd", attn.astype(vh.dtype), vh,
                        preferred_element_type=jnp.float32)      # (Bt, T, hd) f32
        head_outs.append(ho.reshape(M, hd))

    group_out = head_outs[0] if G == 1 else jnp.concatenate(head_outs, axis=-1)
    group_out = group_out.astype(x.dtype)                        # (M, G*hd)

    # ---- grouped output projection: (M, G*hd) @ (G*hd, D), accumulate in f32 ----
    w_proj = wproj_ref[0].astype(x.dtype)                        # (gh, D)
    acc_ref[...] += jnp.dot(group_out, w_proj,
                            preferred_element_type=jnp.float32)  # (M, D) f32

    @pl.when(g == pl.num_programs(1) - 1)
    def _finalize():
        out = acc_ref[...] + bproj_ref[...].astype(jnp.float32)
        o_ref[...] = out.reshape(Bt, T, D).astype(o_ref.dtype)


# ----------------------------------------------------------------------------- tuning


def _tpu_config():
    """Generation-aware VMEM budget / limit, MXU width and min batch tiles."""
    kind = ""
    try:
        kind = jax.devices()[0].device_kind.lower()
    except Exception:
        pass
    if "v7" in kind or "tpu7" in kind:
        # 64 MiB physical per-TC VMEM; keep >=2 batch tiles so both TCs get work.
        return dict(budget=40 << 20, vmem_limit=48 << 20, mxu=256, min_batch_tiles=2)
    if "v6" in kind:
        # 128 MiB physical VMEM; raise the scoped limit well past the 32 MiB default.
        return dict(budget=48 << 20, vmem_limit=64 << 20, mxu=256, min_batch_tiles=1)
    # v5e / v5p / v4 / unknown: conservative (v5e default scoped VMEM is 16 MiB).
    return dict(budget=12 << 20, vmem_limit=None, mxu=128, min_batch_tiles=1)


def _pick_head_group(H, hd, mxu_width):
    """Smallest group of heads whose QKV slab width (3*G*hd) and proj contraction
    depth (G*hd) are MXU-aligned; falls back to lane alignment / all heads."""
    divisors = [g for g in range(1, H + 1) if H % g == 0]
    for g in divisors:
        if (3 * g * hd) % mxu_width == 0 and (g * hd) % mxu_width == 0:
            return g
    for g in divisors:
        if (3 * g * hd) % mxu_width == 0:
            return g
    for g in divisors:
        if (3 * g * hd) % 128 == 0:
            return g
    return H  # tiny models (e.g. the demo shape): one group = all heads


def _estimate_step_vmem(bt, T, D, hd, G):
    """Conservative f32-bytes estimate of the per-grid-step working set."""
    gh = G * hd
    io_blocks = 2 * 2 * bt * T * D                    # x + out blocks, double-buffered
    acc = bt * T * D                                  # f32 accumulator scratch
    weights = 2 * (D * 3 * gh + 3 * gh + gh * D + D)  # double-buffered group params
    qkv = 2 * bt * T * 3 * gh                         # f32 qkv intermediate + q/k/v casts
    scores = 3 * bt * G * T * T                       # s, p, attn (conservative: per-head x G)
    head_out = 2 * bt * T * gh                        # f32 group output + cast
    return 4 * (io_blocks + acc + weights + qkv + scores + head_out)


def _pick_batch_tile(B, T, D, hd, G, budget_bytes, min_batch_tiles=1):
    divisors = [bt for bt in range(1, B + 1) if B % bt == 0]
    feasible = [bt for bt in divisors
                if _estimate_step_vmem(bt, T, D, hd, G) <= budget_bytes]
    if not feasible:
        feasible = [1]
    # Keep >= min_batch_tiles steps on the "parallel" batch axis (v7x megacore);
    # ignore the constraint when the batch is too small to satisfy it.
    constrained = [bt for bt in feasible if B // bt >= min_batch_tiles]
    if constrained:
        feasible = constrained
    return max(feasible)


# ----------------------------------------------------------------------------- wrapper


def attention_pallas(x, w_qkv, b_qkv, w_proj, b_proj, *, n_heads,
                     batch_tile=None, heads_per_group=None):
    B, T, D = x.shape
    H = n_heads
    if D % H != 0:
        raise ValueError("dim must be divisible by n_heads")
    hd = D // H
    scale = hd ** (-0.5)

    # Explicit packing-order assertions (PyTorch qkv = nn.Linear(dim, 3*dim),
    # columns ordered [q|k|v] x [head] x [hd]; weights pre-transposed for x @ W).
    assert w_qkv.shape == (D, 3 * D), "w_qkv must be (D, 3D) in x @ W convention"
    assert w_proj.shape == (D, D), "w_proj must be (D, D) in x @ W convention"
    b_qkv_flat = jnp.asarray(b_qkv).reshape(3 * D)
    b_proj2 = jnp.asarray(b_proj).reshape(1, D)

    cfg = _tpu_config()
    G = heads_per_group if heads_per_group is not None else _pick_head_group(H, hd, cfg["mxu"])
    assert H % G == 0, "heads_per_group must divide n_heads"
    NG = H // G
    gh = G * hd

    Bt = batch_tile if batch_tile is not None else _pick_batch_tile(
        B, T, D, hd, G, cfg["budget"], cfg["min_batch_tiles"])
    assert B % Bt == 0, "batch tile must divide batch"

    # ---- host-side regroup (runs once; essentially free) --------------------
    # Per-group slab (D, 3*G*hd) laid out [q_heads | k_heads | v_heads]; the
    # softmax scale is folded into the q columns and the q bias.
    w5 = w_qkv.reshape(D, 3, NG, G, hd)
    w5 = w5.at[:, 0].multiply(scale)                                  # fold scale into q
    w_qkv_g = jnp.transpose(w5, (2, 0, 1, 3, 4)).reshape(NG, D, 3 * gh)

    b5 = b_qkv_flat.reshape(3, NG, G, hd)
    b5 = b5.at[0].multiply(scale)
    b_qkv_g = jnp.transpose(b5, (1, 0, 2, 3)).reshape(NG, 1, 3 * gh)

    w_proj_g = w_proj.reshape(NG, gh, D)          # rows [NG][G][hd] -> per-group (gh, D)

    kernel = functools.partial(_attention_kernel, heads_per_group=G, head_dim=hd)

    return pl.pallas_call(
        kernel,
        out_shape=jax.ShapeDtypeStruct((B, T, D), x.dtype),
        grid_spec=pltpu.PrefetchScalarGridSpec(
            num_scalar_prefetch=0,
            grid=(B // Bt, NG),                                       # group axis = reduction, last
            in_specs=[
                pl.BlockSpec((Bt, T, D), lambda b, g: (b, 0, 0)),      # x (re-used across g)
                pl.BlockSpec((1, D, 3 * gh), lambda b, g: (g, 0, 0)),  # grouped qkv weights
                pl.BlockSpec((1, 1, 3 * gh), lambda b, g: (g, 0, 0)),  # grouped qkv bias
                pl.BlockSpec((1, gh, D), lambda b, g: (g, 0, 0)),      # grouped proj rows
                pl.BlockSpec((1, D), lambda b, g: (0, 0)),             # proj bias
            ],
            out_specs=pl.BlockSpec((Bt, T, D), lambda b, g: (b, 0, 0)),
            scratch_shapes=[pltpu.VMEM((Bt * T, D), jnp.float32)],     # output accumulator
        ),
        compiler_params=pltpu.CompilerParams(
            dimension_semantics=("parallel", "arbitrary"),
            vmem_limit_bytes=cfg["vmem_limit"]),
    )(x, w_qkv_g, b_qkv_g, w_proj_g, b_proj2)


# ----------------------------------------------------------------------------- reference


def attention_ref(x, w_qkv, b_qkv, w_proj, b_proj, *, n_heads):
    """Pure-JAX reference mirroring the PyTorch forward exactly."""
    B, T, D = x.shape
    hd = D // n_heads
    scale = hd ** (-0.5)
    qkv = x @ w_qkv + b_qkv                                   # (B, T, 3D)
    qkv = qkv.reshape(B, T, 3, n_heads, hd).transpose(2, 0, 3, 1, 4)
    q, k, v = qkv[0], qkv[1], qkv[2]                          # (B, H, T, hd)
    dp = jnp.einsum("bhqd,bhkd->bhqk", q, k) * scale
    attn = jax.nn.softmax(dp, axis=-1)
    wa = jnp.einsum("bhqk,bhkd->bhqd", attn, v)               # (B, H, T, hd)
    wa = wa.transpose(0, 2, 1, 3).reshape(B, T, D)
    return wa @ w_proj + b_proj


if __name__ == "__main__":
    # small shapes consistent with the module: batch=2, tokens=8, dim=32, heads=4
    B, T, D, H = 2, 8, 32, 4

    key = jax.random.PRNGKey(0)
    kx, k1, k2, k3, k4 = jax.random.split(key, 5)

    x = jax.random.normal(kx, (B, T, D), dtype=jnp.float32)
    # deterministic synthetic parameters (pre-transposed for x @ W convention)
    w_qkv = jax.random.normal(k1, (D, 3 * D), dtype=jnp.float32) * 0.05
    b_qkv = jax.random.normal(k2, (1, 3 * D), dtype=jnp.float32) * 0.05
    w_proj = jax.random.normal(k3, (D, D), dtype=jnp.float32) * 0.05
    b_proj = jax.random.normal(k4, (1, D), dtype=jnp.float32) * 0.05

    out = attention_pallas(x, w_qkv, b_qkv, w_proj, b_proj, n_heads=H)
    out = jax.block_until_ready(out)

    ref = attention_ref(x, w_qkv, b_qkv, w_proj, b_proj, n_heads=H)
    assert out.shape == (B, T, D)
    # tolerance loosened slightly for the EUP approx-reciprocal softmax denominator
    assert jnp.allclose(out, ref, atol=2e-3, rtol=2e-3), "mismatch vs reference"

    print("KERNEL_OK")
</pallas_src>

<mosaic_0001>
module attributes {stable_mosaic.version = 11 : i64} {
  func.func @_attention_kernel(%arg0: i32, %arg1: i32, %arg2: memref<2x8x32xf32, #tpu.memory_space<vmem>>, %arg3: memref<1x32x96xf32, #tpu.memory_space<vmem>>, %arg4: memref<1x1x96xf32, #tpu.memory_space<vmem>>, %arg5: memref<1x32x32xf32, #tpu.memory_space<vmem>>, %arg6: memref<1x32xf32, #tpu.memory_space<vmem>>, %arg7: memref<2x8x32xf32, #tpu.memory_space<vmem>>, %arg8: memref<16x32xf32, #tpu.memory_space<vmem>>) attributes {dimension_semantics = [#tpu.dimension_semantics<parallel>, #tpu.dimension_semantics<arbitrary>], iteration_bounds = array<i64: 1, 1>, scalar_prefetch = 0 : i64, scratch_operands = 1 : i64, tpu.core_type = #tpu.core_type<tc>, window_params = [{transform_indices = @transform_0, window_bounds = array<i64: 2, 8, 32>}, {transform_indices = @transform_1, window_bounds = array<i64: 1, 32, 96>}, {transform_indices = @transform_2, window_bounds = array<i64: 1, 1, 96>}, {transform_indices = @transform_3, window_bounds = array<i64: 1, 32, 32>}, {pipeline_mode = #tpu.pipeline_mode<synchronous>, transform_indices = @transform_4, window_bounds = array<i64: 1, 32>}, {transform_indices = @transform_5, window_bounds = array<i64: 2, 8, 32>}]} {
    %c0_i32 = arith.constant 0 : i32
    %0 = arith.cmpi eq, %arg1, %c0_i32 : i32
    %1 = arith.extui %0 : i1 to i32
    %c0_i32_0 = arith.constant 0 : i32
    %2 = arith.cmpi ne, %1, %c0_i32_0 : i32
    scf.if %2 {
      %cst_35 = arith.constant 0.000000e+00 : f32
      %101 = vector.broadcast %cst_35 : f32 to vector<16x32xf32>
      %c0_36 = arith.constant 0 : index
      %c0_37 = arith.constant 0 : index
      %102 = vector.load %arg8[%c0_36, %c0_37] : memref<16x32xf32, #tpu.memory_space<vmem>>, vector<16x32xf32>
      tpu.vector_store %arg8[%c0_36, %c0_37], %101 {strides = array<i32>} : memref<16x32xf32, #tpu.memory_space<vmem>>, vector<16x32xf32>,
    } else {
    }
    %c0 = arith.constant 0 : index
    %c0_1 = arith.constant 0 : index
    %c0_2 = arith.constant 0 : index
    %3 = vector.load %arg2[%c0, %c0_1, %c0_2] : memref<2x8x32xf32, #tpu.memory_space<vmem>>, vector<2x8x32xf32>
    %4 = vector.shape_cast %3 : vector<2x8x32xf32> to vector<16x32xf32>
    %c0_3 = arith.constant 0 : index
    %c0_4 = arith.constant 0 : index
    %c0_5 = arith.constant 0 : index
    %5 = vector.load %arg3[%c0_3, %c0_4, %c0_5] : memref<1x32x96xf32, #tpu.memory_space<vmem>>, vector<1x32x96xf32>
    %6 = vector.shape_cast %5 : vector<1x32x96xf32> to vector<32x96xf32>
    %cst = arith.constant dense<0.000000e+00> : vector<16x96xf32>
    %7 = tpu.matmul %4, %6, %cst {dimension_numbers = #tpu.dot_dimension_numbers<[1], [0], [0], [1], [0, 0, 1, 1], [], []>} : vector<16x32xf32>, vector<32x96xf32>, vector<16x96xf32> -> vector<16x96xf32>
    %c0_6 = arith.constant 0 : index
    %c0_7 = arith.constant 0 : index
    %c0_8 = arith.constant 0 : index
    %8 = vector.load %arg4[%c0_6, %c0_7, %c0_8] : memref<1x1x96xf32, #tpu.memory_space<vmem>>, vector<1x1x96xf32>
    %9 = vector.shape_cast %8 : vector<1x1x96xf32> to vector<1x96xf32>
    %10 = vector.broadcast %9 : vector<1x96xf32> to vector<16x96xf32>
    %11 = arith.addf %7, %10 : vector<16x96xf32>
    %12 = vector.extract_strided_slice %11 {offsets = [0, 0], sizes = [16, 32], strides = [1, 1]} : vector<16x96xf32> to vector<16x32xf32>
    %13 = vector.extract_strided_slice %11 {offsets = [0, 32], sizes = [16, 32], strides = [1, 1]} : vector<16x96xf32> to vector<16x32xf32>
    %14 = vector.extract_strided_slice %11 {offsets = [0, 64], sizes = [16, 32], strides = [1, 1]} : vector<16x96xf32> to vector<16x32xf32>
    %15 = vector.extract_strided_slice %12 {offsets = [0, 0], sizes = [16, 8], strides = [1, 1]} : vector<16x32xf32> to vector<16x8xf32>
    %16 = vector.shape_cast %15 : vector<16x8xf32> to vector<2x8x8xf32>
    %17 = vector.extract_strided_slice %13 {offsets = [0, 0], sizes = [16, 8], strides = [1, 1]} : vector<16x32xf32> to vector<16x8xf32>
    %18 = vector.shape_cast %17 : vector<16x8xf32> to vector<2x8x8xf32>
    %19 = vector.extract_strided_slice %14 {offsets = [0, 0], sizes = [16, 8], strides = [1, 1]} : vector<16x32xf32> to vector<16x8xf32>
    %20 = vector.shape_cast %19 : vector<16x8xf32> to vector<2x8x8xf32>
    "tpu.trace_start"() <{level = 10 : i32, message = "bqd,bkd->bqk"}> : () -> ()
    %cst_9 = arith.constant dense<0.000000e+00> : vector<2x8x8xf32>
    %21 = tpu.matmul %16, %18, %cst_9 {dimension_numbers = #tpu.dot_dimension_numbers<[2], [2], [1], [1], [0, 0, 0, 1, 1, 1], [0], [0]>} : vector<2x8x8xf32>, vector<2x8x8xf32>, vector<2x8x8xf32> -> vector<2x8x8xf32>
    "tpu.trace_stop"() : () -> ()
    %cst_10 = arith.constant dense<0xFF800000> : vector<2x8xf32>
    %22 = vector.multi_reduction <maximumf>, %21, %cst_10 [2] : vector<2x8x8xf32> to vector<2x8xf32>
    %23 = vector.shape_cast %22 : vector<2x8xf32> to vector<2x8x1xf32>
    %24 = vector.broadcast %23 : vector<2x8x1xf32> to vector<2x8x8xf32>
    %25 = arith.subf %21, %24 : vector<2x8x8xf32>
    %26 = math.exp %25 : vector<2x8x8xf32>
    %cst_11 = arith.constant dense<0.000000e+00> : vector<2x8xf32>
    %27 = vector.multi_reduction <add>, %26, %cst_11 [2] : vector<2x8x8xf32> to vector<2x8xf32>
    %28 = vector.shape_cast %27 : vector<2x8xf32> to vector<2x8x1xf32>
    %29 = tpu.reciprocal %28 {approx = true} : vector<2x8x1xf32> -> vector<2x8x1xf32>
    %30 = vector.broadcast %29 : vector<2x8x1xf32> to vector<2x8x8xf32>
    %31 = arith.mulf %26, %30 : vector<2x8x8xf32>
    "tpu.trace_start"() <{level = 10 : i32, message = "bqk,bkd->bqd"}> : () -> ()
    %cst_12 = arith.constant dense<0.000000e+00> : vector<2x8x8xf32>
    %32 = tpu.matmul %31, %20, %cst_12 {dimension_numbers = #tpu.dot_dimension_numbers<[2], [1], [1], [2], [0, 0, 0, 1, 1, 2], [0], [0]>} : vector<2x8x8xf32>, vector<2x8x8xf32>, vector<2x8x8xf32> -> vector<2x8x8xf32>
    "tpu.trace_stop"() : () -> ()
    %33 = vector.shape_cast %32 : vector<2x8x8xf32> to vector<16x8xf32>
    %34 = vector.extract_strided_slice %12 {offsets = [0, 8], sizes = [16, 8], strides = [1, 1]} : vector<16x32xf32> to vector<16x8xf32>
    %35 = vector.shape_cast %34 : vector<16x8xf32> to vector<2x8x8xf32>
    %36 = vector.extract_strided_slice %13 {offsets = [0, 8], sizes = [16, 8], strides = [1, 1]} : vector<16x32xf32> to vector<16x8xf32>
    %37 = vector.shape_cast %36 : vector<16x8xf32> to vector<2x8x8xf32>
    %38 = vector.extract_strided_slice %14 {offsets = [0, 8], sizes = [16, 8], strides = [1, 1]} : vector<16x32xf32> to vector<16x8xf32>
    %39 = vector.shape_cast %38 : vector<16x8xf32> to vector<2x8x8xf32>
    "tpu.trace_start"() <{level = 10 : i32, message = "bqd,bkd->bqk"}> : () -> ()
    %cst_13 = arith.constant dense<0.000000e+00> : vector<2x8x8xf32>
    %40 = tpu.matmul %35, %37, %cst_13 {dimension_numbers = #tpu.dot_dimension_numbers<[2], [2], [1], [1], [0, 0, 0, 1, 1, 1], [0], [0]>} : vector<2x8x8xf32>, vector<2x8x8xf32>, vector<2x8x8xf32> -> vector<2x8x8xf32>
    "tpu.trace_stop"() : () -> ()
    %cst_14 = arith.constant dense<0xFF800000> : vector<2x8xf32>
    %41 = vector.multi_reduction <maximumf>, %40, %cst_14 [2] : vector<2x8x8xf32> to vector<2x8xf32>
    %42 = vector.shape_cast %41 : vector<2x8xf32> to vector<2x8x1xf32>
    %43 = vector.broadcast %42 : vector<2x8x1xf32> to vector<2x8x8xf32>
    %44 = arith.subf %40, %43 : vector<2x8x8xf32>
    %45 = math.exp %44 : vector<2x8x8xf32>
    %cst_15 = arith.constant dense<0.000000e+00> : vector<2x8xf32>
    %46 = vector.multi_reduction <add>, %45, %cst_15 [2] : vector<2x8x8xf32> to vector<2x8xf32>
    %47 = vector.shape_cast %46 : vector<2x8xf32> to vector<2x8x1xf32>
    %48 = tpu.reciprocal %47 {approx = true} : vector<2x8x1xf32> -> vector<2x8x1xf32>
    %49 = vector.broadcast %48 : vector<2x8x1xf32> to vector<2x8x8xf32>
    %50 = arith.mulf %45, %49 : vector<2x8x8xf32>
    "tpu.trace_start"() <{level = 10 : i32, message = "bqk,bkd->bqd"}> : () -> ()
    %cst_16 = arith.constant dense<0.000000e+00> : vector<2x8x8xf32>
    %51 = tpu.matmul %50, %39, %cst_16 {dimension_numbers = #tpu.dot_dimension_numbers<[2], [1], [1], [2], [0, 0, 0, 1, 1, 2], [0], [0]>} : vector<2x8x8xf32>, vector<2x8x8xf32>, vector<2x8x8xf32> -> vector<2x8x8xf32>
    "tpu.trace_stop"() : () -> ()
    %52 = vector.shape_cast %51 : vector<2x8x8xf32> to vector<16x8xf32>
    %53 = vector.extract_strided_slice %12 {offsets = [0, 16], sizes = [16, 8], strides = [1, 1]} : vector<16x32xf32> to vector<16x8xf32>
    %54 = vector.shape_cast %53 : vector<16x8xf32> to vector<2x8x8xf32>
    %55 = vector.extract_strided_slice %13 {offsets = [0, 16], sizes = [16, 8], strides = [1, 1]} : vector<16x32xf32> to vector<16x8xf32>
    %56 = vector.shape_cast %55 : vector<16x8xf32> to vector<2x8x8xf32>
    %57 = vector.extract_strided_slice %14 {offsets = [0, 16], sizes = [16, 8], strides = [1, 1]} : vector<16x32xf32> to vector<16x8xf32>
    %58 = vector.shape_cast %57 : vector<16x8xf32> to vector<2x8x8xf32>
    "tpu.trace_start"() <{level = 10 : i32, message = "bqd,bkd->bqk"}> : () -> ()
    %cst_17 = arith.constant dense<0.000000e+00> : vector<2x8x8xf32>
    %59 = tpu.matmul %54, %56, %cst_17 {dimension_numbers = #tpu.dot_dimension_numbers<[2], [2], [1], [1], [0, 0, 0, 1, 1, 1], [0], [0]>} : vector<2x8x8xf32>, vector<2x8x8xf32>, vector<2x8x8xf32> -> vector<2x8x8xf32>
    "tpu.trace_stop"() : () -> ()
    %cst_18 = arith.constant dense<0xFF800000> : vector<2x8xf32>
    %60 = vector.multi_reduction <maximumf>, %59, %cst_18 [2] : vector<2x8x8xf32> to vector<2x8xf32>
    %61 = vector.shape_cast %60 : vector<2x8xf32> to vector<2x8x1xf32>
    %62 = vector.broadcast %61 : vector<2x8x1xf32> to vector<2x8x8xf32>
    %63 = arith.subf %59, %62 : vector<2x8x8xf32>
    %64 = math.exp %63 : vector<2x8x8xf32>
    %cst_19 = arith.constant dense<0.000000e+00> : vector<2x8xf32>
    %65 = vector.multi_reduction <add>, %64, %cst_19 [2] : vector<2x8x8xf32> to vector<2x8xf32>
    %66 = vector.shape_cast %65 : vector<2x8xf32> to vector<2x8x1xf32>
    %67 = tpu.reciprocal %66 {approx = true} : vector<2x8x1xf32> -> vector<2x8x1xf32>
    %68 = vector.broadcast %67 : vector<2x8x1xf32> to vector<2x8x8xf32>
    %69 = arith.mulf %64, %68 : vector<2x8x8xf32>
    "tpu.trace_start"() <{level = 10 : i32, message = "bqk,bkd->bqd"}> : () -> ()
    %cst_20 = arith.constant dense<0.000000e+00> : vector<2x8x8xf32>
    %70 = tpu.matmul %69, %58, %cst_20 {dimension_numbers = #tpu.dot_dimension_numbers<[2], [1], [1], [2], [0, 0, 0, 1, 1, 2], [0], [0]>} : vector<2x8x8xf32>, vector<2x8x8xf32>, vector<2x8x8xf32> -> vector<2x8x8xf32>
    "tpu.trace_stop"() : () -> ()
    %71 = vector.shape_cast %70 : vector<2x8x8xf32> to vector<16x8xf32>
    %72 = vector.extract_strided_slice %12 {offsets = [0, 24], sizes = [16, 8], strides = [1, 1]} : vector<16x32xf32> to vector<16x8xf32>
    %73 = vector.shape_cast %72 : vector<16x8xf32> to vector<2x8x8xf32>
    %74 = vector.extract_strided_slice %13 {offsets = [0, 24], sizes = [16, 8], strides = [1, 1]} : vector<16x32xf32> to vector<16x8xf32>
    %75 = vector.shape_cast %74 : vector<16x8xf32> to vector<2x8x8xf32>
    %76 = vector.extract_strided_slice %14 {offsets = [0, 24], sizes = [16, 8], strides = [1, 1]} : vector<16x32xf32> to vector<16x8xf32>
    %77 = vector.shape_cast %76 : vector<16x8xf32> to vector<2x8x8xf32>
    "tpu.trace_start"() <{level = 10 : i32, message = "bqd,bkd->bqk"}> : () -> ()
    %cst_21 = arith.constant dense<0.000000e+00> : vector<2x8x8xf32>
    %78 = tpu.matmul %73, %75, %cst_21 {dimension_numbers = #tpu.dot_dimension_numbers<[2], [2], [1], [1], [0, 0, 0, 1, 1, 1], [0], [0]>} : vector<2x8x8xf32>, vector<2x8x8xf32>, vector<2x8x8xf32> -> vector<2x8x8xf32>
    "tpu.trace_stop"() : () -> ()
    %cst_22 = arith.constant dense<0xFF800000> : vector<2x8xf32>
    %79 = vector.multi_reduction <maximumf>, %78, %cst_22 [2] : vector<2x8x8xf32> to vector<2x8xf32>
    %80 = vector.shape_cast %79 : vector<2x8xf32> to vector<2x8x1xf32>
    %81 = vector.broadcast %80 : vector<2x8x1xf32> to vector<2x8x8xf32>
    %82 = arith.subf %78, %81 : vector<2x8x8xf32>
    %83 = math.exp %82 : vector<2x8x8xf32>
    %cst_23 = arith.constant dense<0.000000e+00> : vector<2x8xf32>
    %84 = vector.multi_reduction <add>, %83, %cst_23 [2] : vector<2x8x8xf32> to vector<2x8xf32>
    %85 = vector.shape_cast %84 : vector<2x8xf32> to vector<2x8x1xf32>
    %86 = tpu.reciprocal %85 {approx = true} : vector<2x8x1xf32> -> vector<2x8x1xf32>
    %87 = vector.broadcast %86 : vector<2x8x1xf32> to vector<2x8x8xf32>
    %88 = arith.mulf %83, %87 : vector<2x8x8xf32>
    "tpu.trace_start"() <{level = 10 : i32, message = "bqk,bkd->bqd"}> : () -> ()
    %cst_24 = arith.constant dense<0.000000e+00> : vector<2x8x8xf32>
    %89 = tpu.matmul %88, %77, %cst_24 {dimension_numbers = #tpu.dot_dimension_numbers<[2], [1], [1], [2], [0, 0, 0, 1, 1, 2], [0], [0]>} : vector<2x8x8xf32>, vector<2x8x8xf32>, vector<2x8x8xf32> -> vector<2x8x8xf32>
    "tpu.trace_stop"() : () -> ()
    %90 = vector.shape_cast %89 : vector<2x8x8xf32> to vector<16x8xf32>
    %91 = tpu.concatenate %33, %52, %71, %90 in 1 : vector<16x8xf32>, vector<16x8xf32>, vector<16x8xf32>, vector<16x8xf32> -> vector<16x32xf32>
    %c0_25 = arith.constant 0 : index
    %c0_26 = arith.constant 0 : index
    %c0_27 = arith.constant 0 : index
    %92 = vector.load %arg5[%c0_25, %c0_26, %c0_27] : memref<1x32x32xf32, #tpu.memory_space<vmem>>, vector<1x32x32xf32>
    %93 = vector.shape_cast %92 : vector<1x32x32xf32> to vector<32x32xf32>
    %c0_28 = arith.constant 0 : index
    %c0_29 = arith.constant 0 : index
    %94 = vector.load %arg8[%c0_28, %c0_29] : memref<16x32xf32, #tpu.memory_space<vmem>>, vector<16x32xf32>
    %cst_30 = arith.constant dense<0.000000e+00> : vector<16x32xf32>
    %95 = tpu.matmul %91, %93, %cst_30 {dimension_numbers = #tpu.dot_dimension_numbers<[1], [0], [0], [1], [0, 0, 1, 1], [], []>} : vector<16x32xf32>, vector<32x32xf32>, vector<16x32xf32> -> vector<16x32xf32>
    %96 = arith.addf %94, %95 : vector<16x32xf32>
    %c0_31 = arith.constant 0 : index
    %c0_32 = arith.constant 0 : index
    %97 = vector.load %arg8[%c0_31, %c0_32] : memref<16x32xf32, #tpu.memory_space<vmem>>, vector<16x32xf32>
    tpu.vector_store %arg8[%c0_31, %c0_32], %96 {strides = array<i32>} : memref<16x32xf32, #tpu.memory_space<vmem>>, vector<16x32xf32>,
    %c0_i32_33 = arith.constant 0 : i32
    %98 = arith.cmpi eq, %arg1, %c0_i32_33 : i32
    %99 = arith.extui %98 : i1 to i32
    %c0_i32_34 = arith.constant 0 : i32
    %100 = arith.cmpi ne, %99, %c0_i32_34 : i32
    scf.if %100 {
      %c0_35 = arith.constant 0 : index
      %c0_36 = arith.constant 0 : index
      %101 = vector.load %arg8[%c0_35, %c0_36] : memref<16x32xf32, #tpu.memory_space<vmem>>, vector<16x32xf32>
      %c0_37 = arith.constant 0 : index
      %c0_38 = arith.constant 0 : index
      %102 = vector.load %arg6[%c0_37, %c0_38] : memref<1x32xf32, #tpu.memory_space<vmem>>, vector<1x32xf32>
      %103 = vector.broadcast %102 : vector<1x32xf32> to vector<16x32xf32>
      %104 = arith.addf %101, %103 : vector<16x32xf32>
      %105 = vector.shape_cast %104 : vector<16x32xf32> to vector<2x8x32xf32>
      %c0_39 = arith.constant 0 : index
      %c0_40 = arith.constant 0 : index
      %c0_41 = arith.constant 0 : index
      %106 = vector.load %arg7[%c0_39, %c0_40, %c0_41] : memref<2x8x32xf32, #tpu.memory_space<vmem>>, vector<2x8x32xf32>
      tpu.vector_store %arg7[%c0_39, %c0_40, %c0_41], %105 {strides = array<i32>} : memref<2x8x32xf32, #tpu.memory_space<vmem>>, vector<2x8x32xf32>,
    } else {
    }
    return
  }
  func.func @transform_0(%arg0: i32, %arg1: i32) -> (i32, i32, i32) {
    %c0_i32 = arith.constant 0 : i32
    %c0_i32_0 = arith.constant 0 : i32
    %c0_i32_1 = arith.constant 0 : i32
    return %arg0, %c0_i32, %c0_i32_0 : i32, i32, i32
  }
  func.func @transform_1(%arg0: i32, %arg1: i32) -> (i32, i32, i32) {
    %c0_i32 = arith.constant 0 : i32
    %c0_i32_0 = arith.constant 0 : i32
    %c0_i32_1 = arith.constant 0 : i32
    return %arg1, %c0_i32, %c0_i32_0 : i32, i32, i32
  }
  func.func @transform_2(%arg0: i32, %arg1: i32) -> (i32, i32, i32) {
    %c0_i32 = arith.constant 0 : i32
    %c0_i32_0 = arith.constant 0 : i32
    %c0_i32_1 = arith.constant 0 : i32
    return %arg1, %c0_i32, %c0_i32_0 : i32, i32, i32
  }
  func.func @transform_3(%arg0: i32, %arg1: i32) -> (i32, i32, i32) {
    %c0_i32 = arith.constant 0 : i32
    %c0_i32_0 = arith.constant 0 : i32
    %c0_i32_1 = arith.constant 0 : i32
    return %arg1, %c0_i32, %c0_i32_0 : i32, i32, i32
  }
  func.func @transform_4(%arg0: i32, %arg1: i32) -> (i32, i32) {
    %c0_i32 = arith.constant 0 : i32
    %c0_i32_0 = arith.constant 0 : i32
    %c0_i32_1 = arith.constant 0 : i32
    return %c0_i32, %c0_i32_0 : i32, i32
  }
  func.func @transform_5(%arg0: i32, %arg1: i32) -> (i32, i32, i32) {
    %c0_i32 = arith.constant 0 : i32
    %c0_i32_0 = arith.constant 0 : i32
    %c0_i32_1 = arith.constant 0 : i32
    return %arg0, %c0_i32, %c0_i32_0 : i32, i32, i32
  }
}

</mosaic_0001>

<bundles_post_ra>
// kernel: tpu_custom_call.1
= control target key start
LH: loop header
LB: loop body
LE: loop exit
PB: predicated region body
PF: predicated region fallthrough
CT: control target
= control target key end

     0   :  { %10 = vsyncpa [#allocation4], 0  ;;  %s1120_s0 = inlined_call_operand.hbm [shape: f32[2,8,32], index: 0, kind: input, shape index: {}]   ;;  %s1121_s1 = inlined_call_operand.hbm [shape: f32[1,32,96], index: 1, kind: input, shape index: {}]   ;;  %s1122_s2 = inlined_call_operand.vmem [shape: f32[1,1,96], index: 2, kind: input, shape index: {}]   ;;  %s1123_s3 = inlined_call_operand.hbm [shape: f32[1,32,32], index: 3, kind: input, shape index: {}]   ;;  %s1124_s4 = inlined_call_operand.vmem [shape: f32[1,32], index: 4, kind: input, shape index: {}]   ;;  %s1125_s5 = inlined_call_operand.hbm [shape: f32[2,8,32], index: 5, kind: output, shape index: {}]  }
   0x1   :  { %11 = vsyncpa [#allocation7], 0 }
   0x2   :  { %12 = vsyncpa [#allocation5], 0  ;;  %s30_s20 = sshll.u32 %s1121_s1, 4  ;;  %s932_s21 = smov [#allocation6]   ;;  %s31_s20 = int_to_ptr.hbm [resolvable:$true] %s30_s20 }
   0x3   :  { %s32_s22 = sshll.u32 %s932_s21, 4  ;;  %s17_s25 = sshll.u32 %s1120_s0, 4  ;;  %s33_s22 = int_to_ptr.vmem [resolvable:$true] %s32_s22  ;;  %s18_s25 = int_to_ptr.hbm [resolvable:$true] %s17_s25 }
   0x4   :  { %s933_s26 = smov 128   ;;  %s934_s27 = smov 8  }
   0x5   :  { %38 = dma.hbm_to_vmem [thread:$0]  %s31_s20, 512, %s33_s22, [#allocation7], %s933_s26, %s933_s26, %s934_s27  }
   0x6   :  { %s935_s28 = smov [#allocation3]   ;;  %s45_s1 = sshll.u32 %s1123_s3, 4  ;;  %s46_s1 = int_to_ptr.hbm [resolvable:$true] %s45_s1 }
   0x7   :  { %s19_s29 = sshll.u32 %s935_s28, 4  ;;  %s936_s0 = smov [#allocation8]   ;;  %s20_s29 = int_to_ptr.vmem [resolvable:$true] %s19_s29 }
   0x8   :  { %25 = dma.hbm_to_vmem [thread:$0]  %s18_s25, 256, %s20_s29, [#allocation4], %s933_s26, %s933_s26, %s934_s27  }
   0x9   :  { %s47_s7 = sshll.u32 %s936_s0, 4  ;;  %s48_s7 = int_to_ptr.vmem [resolvable:$true] %s47_s7 }
   0xa   :  { %53 = dma.hbm_to_vmem [thread:$0]  %s46_s1, 512, %s48_s7, [#allocation7], %s933_s26, %s933_s26, %s934_s27  }
   0xb   :  { %926 = dma.done.wait [#allocation4], 256  }
   0xc   :  { %927 = vsyncadd [#allocation4], 4294967040 }
   0xd   :  { %928 = dma.done.wait [#allocation7], 1024  }
   0xe   :  { %929 = vsyncadd [#allocation7], 4294966272  ;;  %v80_v0 = vld [vmem:[#allocation6 + $0x18] sm:$0xff]  ;;  %v79_v1 = vld [vmem:[#allocation6 + $0x10] sm:$0xff]  ;;  %vm72_vm0 = vcmask 261120   ;;  %s937_s9 = smov 88  }
   0xf   :  { %104 = vmatpush.msra.mxu0 %v80_v0  ;;  %v78_v2 = vld [vmem:[#allocation6 + $0x8] sm:$0xff]  ;;  %v77_v3 = vld [vmem:[#allocation6] sm:$0xff]  ;;  %v75_v4 = vld [vmem:[#allocation3] sm:$0xff]  ;;  %s938_s10 = smov 96   ;;  %s939_s11 = smov 80   ;;  %vm118_vm1 = vcmask 64512  }
  0x10   :  { %v76_v5 = vld [vmem:[#allocation3 + $0x8] sm:$0xff]  ;;  %v796_v6 = vld [vmem:[%s1122_s2] ss:$0 sm:$0xff]  ;;  %s940_s2 = smov 120   ;;  %s941_s12 = smov 72   ;;  %vm660_vm2 = vcmask 130048  }
  0x11   :  { %105 = vmatpush.msra.mxu0 %v79_v1  ;;  %s942_s13 = smov 112   ;;  %s943_s14 = smov 104   ;;  %vm663_vm3 = vcmask 195584  }
  0x12   :  { %s944_s15 = smov 56   ;;  %s945_s16 = smov 64  }
  0x13   :  { %106 = vmatpush.msra.mxu0 %v78_v2  ;;  %s946_s17 = smov 48   ;;  %s947_s18 = smov 40  }
  0x14   :  { %s948_s19 = smov 16   ;;  %s949_s20 = smov 24  }
  0x15   :  { %107 = vmatpush.msra.mxu0 %v77_v3  ;;  %s951_s23 = smov [#allocation9]   ;;  %s724_s29 = sshll.u32 %s1125_s5, 4  ;;  %s725_s29 = int_to_ptr.hbm [resolvable:$true] %s724_s29 }
  0x16   :  { %738 = vmatmul.msk.f32.vlgmr.msra.gmra.mxu0 %vm72_vm0, %v75_v4  ;;  %s722_s24 = sshll.u32 %s951_s23, 4  ;;  %s723_s24 = int_to_ptr.vmem [resolvable:$true] %s722_s24 }
  0x1e   :  { %739 = vmatmul.msk.f32.gmra.mxu0 %vm72_vm0, %v76_v5 }
  0x93   :  { %v109_v7 = vpop.f32.mrf.mxu0 }
  0x94   :  { %v1005_v8 = vadd.f32 %v796_v6, %v109_v7 }
  0x96   :  { %246 = vrot.lane.b32.xlu2 %v1005_v8, %s937_s9  ;;  %116 = vrot.lane.b32.xlu0 %v1005_v8, %s938_s10 }
  0x9b   :  { %v112_v9 = vpop.f32.mrf.mxu0 }
  0x9c   :  { %v1009_v10 = vadd.f32 %v796_v6, %v112_v9 }
  0x9e   :  { %274 = vrot.lane.b32.xlu1 %v1009_v10, %s937_s9  ;;  %376 = vrot.lane.b32.xlu2 %v1005_v8, %s939_s11  ;;  %v791_v35 = vpack.i.bf16 %v1009_v10, %v1005_v8 }
  0x9f   :  { %144 = vrot.lane.b32.xlu0 %v1009_v10, %s938_s10 }
  0xa6   :  { %272 = vrot.lane.b32.xlu1 %v1009_v10, %s940_s2  ;;  %506 = vrot.lane.b32.xlu2 %v1005_v8, %s941_s12 }
  0xa7   :  { %244 = vrot.lane.b32.xlu0 %v1005_v8, %s940_s2 }
  0xae   :  { %374 = vrot.lane.b32.xlu1 %v1005_v8, %s942_s13  ;;  %402 = vrot.lane.b32.xlu2 %v1009_v10, %s942_s13 }
  0xaf   :  { %504 = vrot.lane.b32.xlu0 %v1005_v8, %s943_s14 }
  0xb6   :  { %404 = vrot.lane.b32.xlu1 %v1009_v10, %s939_s11 }
  0xb7   :  { %534 = vrot.lane.b32.xlu0 %v1009_v10, %s941_s12 }
  0xbe   :  { %532 = vrot.lane.b32.xlu1 %v1009_v10, %s943_s14 }
  0xf0   :  { %v247_v11 = vpop.permute.xlu2 %246 }
  0xf8   :  { %v377_v13 = vpop.permute.xlu2 %376 }
 0x100   :  { %v507_v17 = vpop.permute.xlu2 %506 }
 0x108   :  { %v117_v12 = vpop.permute.xlu0 %116  ;;  %v403_v23 = vpop.permute.xlu2 %402 }
 0x109   :  { %740 = vmatpush.xpose.msk.msra.mxu1 %vm118_vm1, %v117_v12 }
 0x10c   :  { %741 = vmatmul.msk.f32.vlgmr.msra.gmra.mxu1 %vm118_vm1, %v1005_v8 }
 0x10d   :  { %746 = vmatpush.xpose.msk.msrb.mxu1 %vm118_vm1, %v247_v11 }
 0x110   :  { %v275_v14 = vpop.permute.xlu1 %274 }
 0x111   :  { %v145_v15 = vpop.permute.xlu0 %144  ;;  %748 = vmatpush.xpose.msk.msra.mxu2 %vm118_vm1, %v275_v14 }
 0x112   :  { %742 = vmatpush.xpose.msk.msrb.mxu0 %vm118_vm1, %v145_v15 }
 0x115   :  { %752 = vmatpush.xpose.msk.msrb.mxu2 %vm118_vm1, %v377_v13  ;;  %743 = vmatmul.msk.f32.vlgmr.msrb.gmra.mxu0 %vm118_vm1, %v1009_v10 }
 0x118   :  { %v273_v16 = vpop.permute.xlu1 %272 }
 0x119   :  { %v245_v18 = vpop.permute.xlu0 %244  ;;  %749 = vmatmul.msk.f32.vlgmr.msra.gmra.mxu2 %vm118_vm1, %v273_v16 }
 0x11a   :  { %747 = vmatmul.msk.f32.vlgmr.msrb.gmra.mxu1 %vm118_vm1, %v245_v18  ;;  %758 = vmatpush.xpose.msk.msra.mxu2 %vm118_vm1, %v507_v17 }
 0x120   :  { %v375_v19 = vpop.permute.xlu1 %374 }
 0x121   :  { %v505_v20 = vpop.permute.xlu0 %504  ;;  %753 = vmatmul.msk.f32.vlgmr.msrb.gmra.mxu2 %vm118_vm1, %v375_v19 }
 0x128   :  { %v405_v21 = vpop.permute.xlu1 %404 }
 0x129   :  { %v535_v22 = vpop.permute.xlu0 %534  ;;  %754 = vmatpush.xpose.msk.msra.mxu0 %vm118_vm1, %v405_v21  ;;  %759 = vmatmul.msk.f32.vlgmr.msra.gmra.mxu2 %vm118_vm1, %v505_v20 }
 0x12c   :  { %755 = vmatmul.msk.f32.vlgmr.msra.gmra.mxu0 %vm118_vm1, %v403_v23 }
 0x12d   :  { %760 = vmatpush.xpose.msk.msrb.mxu0 %vm118_vm1, %v535_v22 }
 0x130   :  { %v533_v24 = vpop.permute.xlu1 %532 }
 0x134   :  { %761 = vmatmul.msk.f32.vlgmr.msrb.gmra.mxu0 %vm118_vm1, %v533_v24 }
 0x189   :  { %v140_v25 = vpop.f32.mrf.mxu1 }
 0x18a   :  { %v170_v26 = vsel %vm118_vm1, %v140_v25, -inf }
 0x18b   :  { %171 = vmax.xlane.f32.xlu2 %v170_v26 }
 0x192   :  { %v167_v27 = vpop.f32.mrf.mxu0 }
 0x193   :  { %v173_v28 = vsel %vm118_vm1, %v167_v27, -inf }
 0x194   :  { %174 = vmax.xlane.f32.xlu0 %v173_v28 }
 0x197   :  { %v1043_v29 = vpop.f32.mrf.mxu1 }
 0x198   :  { %v300_v30 = vsel %vm118_vm1, %v1043_v29, -inf }
 0x199   :  { %301 = vmax.xlane.f32.xlu1 %v300_v30 }
 0x19c   :  { %v297_v31 = vpop.f32.mrf.mxu2 }
 0x19d   :  { %v303_v32 = vsel %vm118_vm1, %v297_v31, -inf }
 0x19e   :  { %304 = vmax.xlane.f32.xlu2 %v303_v32 }
 0x1a4   :  { %v399_v33 = vpop.f32.mrf.mxu2 }
 0x1a5   :  { %v430_v34 = vsel %vm118_vm1, %v399_v33, -inf }
 0x1a6   :  { %431 = vmax.xlane.f32.xlu2 %v430_v34 }
 0x1a8   :  { %792 = vrot.lane.b32.xlu0 %v791_v35, %s944_s15 }
 0x1a9   :  { %v427_v36 = vpop.f32.mrf.mxu0 }
 0x1aa   :  { %v433_v37 = vsel %vm118_vm1, %v427_v36, -inf }
 0x1ab   :  { %434 = vmax.xlane.f32.xlu1 %v433_v37 }
 0x1ac   :  { %v529_v38 = vpop.f32.mrf.mxu2 }
 0x1ad   :  { %v560_v39 = vsel %vm118_vm1, %v529_v38, -inf }
 0x1b1   :  { %v1053_v40 = vpop.f32.mrf.mxu0 }
 0x1b2   :  { %v563_v41 = vsel %vm118_vm1, %v1053_v40, -inf }
 0x1be   :  { %787 = vrot.lane.b32.xlu2 %v791_v35, %s945_s16 }
 0x1d2   :  { %561 = vmax.xlane.f32.xlu0 %v560_v39 }
 0x1e7   :  { %564 = vmax.xlane.f32.xlu2 %v563_v41 }
 0x1fe   :  { %v172_v42 = vpop.xlane.xlu2 %171 }
 0x1ff   :  { %v176_v43 = vsub.f32 %v140_v25, %v172_v42  ;;  %452 = vrot.lane.b32.xlu2 %v1005_v8, %s946_s17 }
 0x201   :  { %v178_v44 = vmul.f32 1.442695, %v176_v43 }
 0x203   :  { %798 = vpow2.f32 %v178_v44 }
 0x207   :  { %v175_v45 = vpop.xlane.xlu0 %174 }
 0x208   :  { %v177_v46 = vsub.f32 %v167_v27, %v175_v45 }
 0x209   :  { %v1059_v47 = vpop.eup %798 }
 0x20a   :  { %v180_v48 = vmul.f32 1.442695, %v177_v46  ;;  %v182_v49 = vsel %vm118_vm1, %v1059_v47, 0.0 }
 0x20b   :  { %183 = vadd.xlane.f32.xlu0 %v182_v49 }
 0x20c   :  { %800 = vpow2.f32 %v180_v48  ;;  %v302_v55 = vpop.xlane.xlu1 %301 }
 0x211   :  { %v305_v50 = vpop.xlane.xlu2 %304 }
 0x212   :  { %v1063_v51 = vpop.eup %800  ;;  %v307_v52 = vsub.f32 %v297_v31, %v305_v50 }
 0x213   :  { %v185_v53 = vsel %vm118_vm1, %v1063_v51, 0.0 }
 0x214   :  { %v310_v54 = vmul.f32 1.442695, %v307_v52  ;;  %186 = vadd.xlane.f32.xlu1 %v185_v53 }
 0x216   :  { %802 = vpow2.f32 %v310_v54 }
 0x219   :  { %v432_v56 = vpop.xlane.xlu2 %431 }
 0x21a   :  { %v793_v57 = vpop.permute.xlu0 %792  ;;  %v436_v63 = vsub.f32 %v399_v33, %v432_v56 }
 0x21b   :  { %v795_v58 = vunpack.i.h.bf16 %v793_v57  ;;  %v794_v27 = vunpack.i.l.bf16 %v793_v57 }
 0x21c   :  { %v1067_v59 = vpop.eup %802  ;;  %v438_v4 = vmul.f32 1.442695, %v436_v63  ;;  %v666_v63 = vld [vmem:[#allocation8] sm:$0xff] }
 0x21d   :  { %369 = vmatpush.msra.mxu1 %v795_v58  ;;  %v315_v60 = vsel %vm118_vm1, %v1067_v59, 0.0 }
 0x21e   :  { %v435_v61 = vpop.xlane.xlu1 %434  ;;  %316 = vadd.xlane.f32.xlu1 %v315_v60  ;;  %v669_v60 = vld [vmem:[#allocation8 + $0x18] sm:$0xff] }
 0x21f   :  { %v437_v62 = vsub.f32 %v427_v36, %v435_v61  ;;  %582 = vrot.lane.b32.xlu0 %v1005_v8, %s947_s18  ;;  %v306_v8 = vsub.f32 %v1043_v29, %v302_v55  ;;  %v668_v61 = vld [vmem:[#allocation8 + $0x10] sm:$0xff]  ;;  %690 = vmatpush.msrb.mxu2 %v669_v60 }
 0x221   :  { %v440_v0 = vmul.f32 1.442695, %v437_v62  ;;  %v788_v1 = vpop.permute.xlu2 %787  ;;  %v308_v11 = vmul.f32 1.442695, %v306_v8  ;;  %v667_v62 = vld [vmem:[#allocation8 + $0x8] sm:$0xff]  ;;  %691 = vmatpush.msrb.mxu2 %v668_v61 }
 0x222   :  { %v789_v2 = vunpack.i.l.bf16 %v788_v1  ;;  %v790_v3 = vunpack.i.h.bf16 %v788_v1 }
 0x223   :  { %804 = vpow2.f32 %v440_v0  ;;  %692 = vmatpush.msrb.mxu2 %v667_v62  ;;  %v950_v0 = vmov 0.0  }
 0x224   :  { %213 = vmatpush.msra.mxu3 %v789_v2  ;;  %806 = vpow2.f32 %v438_v4  ;;  %73 = vst.msk [vmem:[#allocation2] sm:$0xff] %vm72_vm0, %v950_v0 }
 0x225   :  { %808 = vpow2.f32 %v308_v11  ;;  %693 = vmatpush.msrb.mxu2 %v666_v63  ;;  %74 = vst.msk [vmem:[#allocation2 + $0x8] sm:$0xff] %vm72_vm0, %v950_v0 }
 0x226   :  { %239 = vmatpush.msrb.mxu3 %v790_v3 }
 0x229   :  { %v1073_v5 = vpop.eup %804 }
 0x22a   :  { %v445_v6 = vsel %vm118_vm1, %v1073_v5, 0.0  ;;  %v807_v7 = vpop.eup %806 }
 0x22b   :  { %446 = vadd.xlane.f32.xlu1 %v445_v6  ;;  %v442_v9 = vsel %vm118_vm1, %v807_v7, 0.0  ;;  %v809_v12 = vpop.eup %808 }
 0x22c   :  { %v312_v16 = vsel %vm118_vm1, %v809_v12, 0.0 }
 0x233   :  { %443 = vadd.xlane.f32.xlu1 %v442_v9 }
 0x245   :  { %v562_v13 = vpop.xlane.xlu0 %561 }
 0x246   :  { %v566_v14 = vsub.f32 %v529_v38, %v562_v13 }
 0x248   :  { %v568_v15 = vmul.f32 1.442695, %v566_v14  ;;  %v670_v14 = vld [vmem:[#allocation2] sm:$0xff] }
 0x249   :  { %313 = vadd.xlane.f32.xlu0 %v312_v16 }
 0x24a   :  { %810 = vpow2.f32 %v568_v15 }
 0x250   :  { %v811_v17 = vpop.eup %810 }
 0x251   :  { %v572_v18 = vsel %vm118_vm1, %v811_v17, 0.0 }
 0x252   :  { %573 = vadd.xlane.f32.xlu1 %v572_v18  ;;  %v671_v18 = vld [vmem:[#allocation2 + $0x8] sm:$0xff] }
 0x25a   :  { %v565_v19 = vpop.xlane.xlu2 %564 }
 0x25b   :  { %v567_v20 = vsub.f32 %v1053_v40, %v565_v19 }
 0x25d   :  { %v570_v21 = vmul.f32 1.442695, %v567_v20  ;;  %608 = vrot.lane.b32.xlu0 %v1009_v10, %s947_s18 }
 0x25f   :  { %812 = vpow2.f32 %v570_v21 }
 0x262   :  { %v453_v31 = vpop.permute.xlu2 %452 }
 0x265   :  { %v813_v22 = vpop.eup %812 }
 0x266   :  { %v575_v23 = vsel %vm118_vm1, %v813_v22, 0.0 }
 0x267   :  { %576 = vadd.xlane.f32.xlu2 %v575_v23 }
 0x26b   :  { %478 = vrot.lane.b32.xlu1 %v1009_v10, %s946_s17 }
 0x27e   :  { %v184_v24 = vpop.xlane.xlu0 %183 }
 0x27f   :  { %814 = vrcp.f32 %v184_v24 }
 0x285   :  { %v815_v25 = vpop.eup %814 }
 0x286   :  { %v190_v26 = vmul.f32 %v815_v25, %v1059_v47 }
 0x287   :  { %v187_v28 = vpop.xlane.xlu1 %186 }
 0x288   :  { %816 = vrcp.f32 %v187_v28  ;;  %744 = vmatmul.msk.f32.vlgmr.msra.gmra.mxu3 %vm118_vm1, %v190_v26 }
 0x289   :  { %343 = vmatpush.msra.mxu3 %v794_v27 }
 0x28e   :  { %v817_v29 = vpop.eup %816 }
 0x28f   :  { %v191_v30 = vmul.f32 %v817_v29, %v1063_v51 }
 0x291   :  { %745 = vmatmul.msk.f32.vlgmr.msrb.gmra.mxu3 %vm118_vm1, %v191_v30  ;;  %v317_v32 = vpop.xlane.xlu1 %316  ;;  %v583_v34 = vpop.permute.xlu0 %582 }
 0x292   :  { %473 = vmatpush.msrb.mxu3 %v453_v31  ;;  %818 = vrcp.f32 %v317_v32 }
 0x298   :  { %v819_v10 = vpop.eup %818 }
 0x299   :  { %v321_v33 = vmul.f32 %v819_v10, %v1067_v59 }
 0x29b   :  { %751 = vmatmul.msk.f32.vlgmr.msra.gmra.mxu1 %vm118_vm1, %v321_v33 }
 0x29e   :  { %v447_v35 = vpop.xlane.xlu1 %446 }
 0x2a6   :  { %v444_v37 = vpop.xlane.xlu1 %443 }
 0x2bc   :  { %v314_v36 = vpop.xlane.xlu0 %313 }
 0x2bd   :  { %820 = vrcp.f32 %v314_v36 }
 0x2be   :  { %822 = vrcp.f32 %v444_v37 }
 0x2c3   :  { %v821_v38 = vpop.eup %820 }
 0x2c4   :  { %v320_v39 = vmul.f32 %v821_v38, %v809_v12  ;;  %v823_v41 = vpop.eup %822 }
 0x2c5   :  { %v574_v40 = vpop.xlane.xlu1 %573  ;;  %v450_v42 = vmul.f32 %v823_v41, %v807_v7 }
 0x2c6   :  { %750 = vmatmul.msk.f32.vlgmr.msra.gmra.mxu3 %vm118_vm1, %v320_v39  ;;  %824 = vrcp.f32 %v574_v40 }
 0x2c7   :  { %603 = vmatpush.msra.mxu3 %v583_v34  ;;  %826 = vrcp.f32 %v447_v35 }
 0x2cc   :  { %v825_v43 = vpop.eup %824 }
 0x2cd   :  { %v580_v44 = vmul.f32 %v825_v43, %v811_v17  ;;  %v827_v45 = vpop.eup %826  ;;  %v797_v17 = vld [vmem:[%s1124_s4] ss:$0 sm:$0xff] }
 0x2ce   :  { %756 = vmatmul.msk.f32.vlgmr.msrb.gmra.mxu3 %vm118_vm1, %v450_v42  ;;  %v451_v47 = vmul.f32 %v827_v45, %v1073_v5 }
 0x2cf   :  { %v609_v49 = vpop.permute.xlu0 %608 }
 0x2d6   :  { %762 = vmatmul.msk.f32.vlgmr.msra.gmra.mxu3 %vm118_vm1, %v580_v44 }
 0x2da   :  { %v577_v46 = vpop.xlane.xlu2 %576 }
 0x2db   :  { %828 = vrcp.f32 %v577_v46 }
 0x2dd   :  { %v479_v48 = vpop.permute.xlu1 %478 }
 0x2de   :  { %499 = vmatpush.msrb.mxu1 %v479_v48 }
 0x2df   :  { %757 = vmatmul.msk.f32.vlgmr.msrb.gmra.mxu1 %vm118_vm1, %v451_v47 }
 0x2e0   :  { %629 = vmatpush.msra.mxu1 %v609_v49 }
 0x2e1   :  { %v829_v50 = vpop.eup %828 }
 0x2e2   :  { %v581_v51 = vmul.f32 %v829_v50, %v813_v22 }
 0x2e7   :  { %763 = vmatmul.msk.f32.vlgmr.msra.gmra.mxu1 %vm118_vm1, %v581_v51 }
 0x30b   :  { %v215_v52 = vpop.f32.mrf.mxu3 }
 0x314   :  { %v241_v53 = vpop.f32.mrf.mxu3 }
 0x318   :  { %v371_v56 = vpop.f32.mrf.mxu1 }
 0x349   :  { %v345_v54 = vpop.f32.mrf.mxu3 }
 0x34a   :  { %636 = vrot.lane.b32.xlu0 %v345_v54, %s934_s27 }
 0x351   :  { %v475_v55 = vpop.f32.mrf.mxu3 }
 0x352   :  { %644 = vrot.lane.b32.xlu0 %v475_v55, %s948_s19 }
 0x359   :  { %v605_v57 = vpop.f32.mrf.mxu3 }
 0x35a   :  { %638 = vrot.lane.b32.xlu0 %v371_v56, %s934_s27  ;;  %652 = vrot.lane.b32.xlu1 %v605_v57, %s949_s20 }
 0x35c   :  { %v501_v58 = vpop.f32.mrf.mxu1 }
 0x362   :  { %646 = vrot.lane.b32.xlu1 %v501_v58, %s948_s19 }
 0x364   :  { %v631_v59 = vpop.f32.mrf.mxu1 }
 0x365   :  { %654 = vrot.lane.b32.xlu0 %v631_v59, %s949_s20 }
 0x3bc   :  { %v637_v1 = vpop.permute.xlu0 %636 }
 0x3bd   :  { %v658_v3 = vsel %vm118_vm1, %v215_v52, %v637_v1 }
 0x3c4   :  { %v645_v2 = vpop.permute.xlu0 %644 }
 0x3c5   :  { %v661_v4 = vsel %vm660_vm2, %v658_v3, %v645_v2 }
 0x3cc   :  { %v653_v5 = vpop.permute.xlu1 %652  ;;  %v639_v7 = vpop.permute.xlu0 %638 }
 0x3cd   :  { %v664_v6 = vsel %vm663_vm3, %v661_v4, %v653_v5  ;;  %v659_v9 = vsel %vm118_vm1, %v241_v53, %v639_v7 }
 0x3ce   :  { %764 = vmatmul.msk.f32.vlgmr.msrb.gmra.mxu2 %vm72_vm0, %v664_v6 }
 0x3d4   :  { %v647_v8 = vpop.permute.xlu1 %646 }
 0x3d5   :  { %v662_v11 = vsel %vm660_vm2, %v659_v9, %v647_v8 }
 0x3d7   :  { %v655_v12 = vpop.permute.xlu0 %654 }
 0x3d8   :  { %v665_v13 = vsel %vm663_vm3, %v662_v11, %v655_v12 }
 0x3d9   :  { %765 = vmatmul.msk.f32.gmra.mxu2 %vm72_vm0, %v665_v13 }
 0x451   :  { %v695_v15 = vpop.f32.mrf.mxu2 }
 0x452   :  { %v701_v16 = vadd.f32 %v695_v15, %v670_v14 }
 0x454   :  { %703 = vst.msk [vmem:[#allocation2] sm:$0xff] %vm72_vm0, %v701_v16 }
 0x45b   :  { %v708_v19 = vld [vmem:[#allocation2] sm:$0xff] }
 0x45c   :  { %v698_v20 = vpop.f32.mrf.mxu2  ;;  %v714_v21 = vadd.f32 %v797_v17, %v708_v19 }
 0x45d   :  { %v702_v22 = vadd.f32 %v698_v20, %v671_v18 }
 0x45e   :  { %716 = vst.msk [vmem:[#allocation9] sm:$0xff] %vm72_vm0, %v714_v21 }
 0x45f   :  { %704 = vst.msk [vmem:[#allocation2 + $0x8] sm:$0xff] %vm72_vm0, %v702_v22 }
 0x466   :  { %v709_v23 = vld [vmem:[#allocation2 + $0x8] sm:$0xff] }
 0x467   :  { %v715_v24 = vadd.f32 %v797_v17, %v709_v23 }
 0x469   :  { %717 = vst.msk [vmem:[#allocation9 + $0x8] sm:$0xff] %vm72_vm0, %v715_v24 }
 0x46a   :  { %730 = dma.vmem_to_hbm [thread:$0]  %s723_s24, 256, %s725_s29, [#allocation5], %s933_s26, %s933_s26, %s934_s27  }
 0x46b   :  { %930 = dma.done.wait [#allocation5], 256  }
 0x46c   :  { %931 = vsyncadd [#allocation5], 4294967040 }
 0x46d   :  { %735 = vsyncpa [#allocation4], 1 }
 0x46e   :  { %736 = vsyncpa [#allocation7], 1 }
 0x46f   :  { %737 = vsyncpa [#allocation5], 1 }

</bundles_post_ra>
